<compile_context>
chip_gen: v7x
topology: tpu7x:2x2x1
jax: 0.10.0
libtpu: 0.0.40
codegen_flags: <defaults>
</compile_context>

<pallas_src>
import functools

import jax
import jax.numpy as jnp
from jax.experimental import pallas as pl
from jax.experimental.pallas import tpu as pltpu


def _round_up(x, m):
    return ((x + m - 1) // m) * m


def _rsage_group_kernel(nk_ref, adj_ref, xsrc_ref, xdst_ref, wn_ref, ws_ref,
                        b_ref, o_ref, acc_n, acc_deg, *, weights_resident):
    """Fused SAGEConv(mean) + HeteroGraphConv sum for one dst node type.

    nk_ref   : (n_rel,)              SMEM  per-relation number of valid src tiles
    adj_ref  : (1, T_DST, T_SRC)     int8  dense dst x src adjacency tile, relation r
    xsrc_ref : (1, T_SRC, F_IN_P)    bf16  src features
    xdst_ref : (T_DST, F_IN_P)       f32   dst features (resident across r, k)
    wn_ref   : (n_rel|1, F_IN_P, F_OUT_P) f32  per-relation W_neigh
    ws_ref   : (F_IN_P, F_OUT_P)     f32   sum_r W_self_r
    b_ref    : (1, F_OUT_P)          f32   sum_r bias_r
    o_ref    : (T_DST, F_OUT_P)      f32   resident output accumulator (sum over r)
    acc_n    : (T_DST, F_IN_P)  f32 scratch : adj @ x_src accumulator over k
    acc_deg  : (T_DST, 1)       f32 scratch : degree accumulator over k
    """
    r = pl.program_id(1)
    k = pl.program_id(2)
    nk = nk_ref[r]

    # --- self term (pre-summed over relations) + summed bias, once per dst tile ---
    @pl.when((r == 0) & (k == 0))
    def _():
        o_ref[...] = jnp.dot(xdst_ref[...], ws_ref[...],
                             preferred_element_type=jnp.float32) + b_ref[...]

    def _partial():
        adj_f = adj_ref[0].astype(jnp.float32)          # int8 -> f32 (exact for 0/1)
        part = jnp.dot(adj_f.astype(jnp.bfloat16), xsrc_ref[0],
                       preferred_element_type=jnp.float32)
        deg = jnp.sum(adj_f, axis=-1, keepdims=True)     # XLU row-sum -> degree
        return part, deg

    # --- aggregation: write-init on the first src tile, accumulate on valid tiles ---
    @pl.when(k == 0)
    def _():
        part, deg = _partial()
        acc_n[...] = part
        acc_deg[...] = deg

    @pl.when((k > 0) & (k < nk))
    def _():
        part, deg = _partial()
        acc_n[...] += part
        acc_deg[...] += deg

    # --- finalize relation r: mean-normalise and add neighbour projection ---
    @pl.when(k == nk - 1)
    def _():
        inv_deg = pl.reciprocal(jnp.maximum(acc_deg[...], 1.0), approx=True)
        neigh = acc_n[...] * inv_deg
        w = wn_ref[r] if weights_resident else wn_ref[0]
        o_ref[...] += jnp.dot(neigh, w, preferred_element_type=jnp.float32)


def _sage_dst_group(rels, h_dst, h_dict, params, f_in, f_out,
                    t_dst=512, t_src=1024):
    """All relations targeting one dst node type, fused into one pallas_call.

    rels : list of (rel_name, src_type, dense_adj (n_dst, n_src))
    """
    n_dst = h_dst.shape[0]

    DST_ALIGN = 32                      # int8 adjacency sublane packing (32, 128)
    t_dst_eff = min(t_dst, _round_up(n_dst, DST_ALIGN))
    # prefer >=2 dst tiles so the parallel axis can shard across TensorCores (v7x)
    if _round_up(n_dst, t_dst_eff) == t_dst_eff and t_dst_eff >= 2 * DST_ALIGN:
        t_dst_eff = _round_up(t_dst_eff // 2, DST_ALIGN)
    n_dst_p = _round_up(n_dst, t_dst_eff)

    n_src_max = max(adj.shape[1] for _, _, adj in rels)
    t_src_eff = min(t_src, _round_up(n_src_max, 128))
    n_src_p = _round_up(n_src_max, t_src_eff)
    n_k = n_src_p // t_src_eff

    f_in_p = _round_up(f_in, 128)
    f_out_p = _round_up(f_out, 128)
    n_rel = len(rels)

    def pad2(a, rows, cols, dtype):
        a = jnp.asarray(a).astype(dtype)
        return jnp.pad(a, ((0, rows - a.shape[0]), (0, cols - a.shape[1])))

    # --- stacked, padded operands (single pad+stack per tensor, no chained .at[].set) ---
    adj_stack = jnp.stack([pad2(adj, n_dst_p, n_src_p, jnp.int8)
                           for _, _, adj in rels])                       # int8 HBM stream
    xsrc_stack = jnp.stack([pad2(h_dict[stype], n_src_p, f_in_p, jnp.bfloat16)
                            for _, stype, _ in rels])
    wn_stack = jnp.stack([pad2(params[rel][0], f_in_p, f_out_p, jnp.float32)
                          for rel, _, _ in rels])
    ws_sum = pad2(sum(params[rel][1] for rel, _, _ in rels),
                  f_in_p, f_out_p, jnp.float32)
    b_sum = pad2(sum(jnp.reshape(params[rel][2], (1, -1)) for rel, _, _ in rels),
                 1, f_out_p, jnp.float32)
    xdst = pad2(h_dst, n_dst_p, f_in_p, jnp.float32)
    nk_arr = jnp.array([max(1, -(-adj.shape[1] // t_src_eff)) for _, _, adj in rels],
                       jnp.int32)

    # Keep all per-relation W_neigh VMEM-resident unless they are unusually large.
    weights_resident = wn_stack.size * 4 <= 8 * 1024 * 1024
    if weights_resident:
        wn_spec = pl.BlockSpec((n_rel, f_in_p, f_out_p),
                               lambda i, r, k, nk: (0, 0, 0))
    else:
        wn_spec = pl.BlockSpec((1, f_in_p, f_out_p),
                               lambda i, r, k, nk: (r, 0, 0))

    grid = (n_dst_p // t_dst_eff, n_rel, n_k)
    kernel = functools.partial(_rsage_group_kernel,
                               weights_resident=weights_resident)

    out_p = pl.pallas_call(
        kernel,
        out_shape=jax.ShapeDtypeStruct((n_dst_p, f_out_p), jnp.float32),
        grid_spec=pltpu.PrefetchScalarGridSpec(
            num_scalar_prefetch=1,
            grid=grid,
            in_specs=[
                # clamp k so padded all-zero src tiles of short relations
                # are never re-streamed (same block index => no DMA)
                pl.BlockSpec((1, t_dst_eff, t_src_eff),
                             lambda i, r, k, nk: (r, i, jnp.minimum(k, nk[r] - 1))),
                pl.BlockSpec((1, t_src_eff, f_in_p),
                             lambda i, r, k, nk: (r, jnp.minimum(k, nk[r] - 1), 0)),
                pl.BlockSpec((t_dst_eff, f_in_p), lambda i, r, k, nk: (i, 0)),
                wn_spec,
                pl.BlockSpec((f_in_p, f_out_p), lambda i, r, k, nk: (0, 0)),
                pl.BlockSpec((1, f_out_p), lambda i, r, k, nk: (0, 0)),
            ],
            out_specs=pl.BlockSpec((t_dst_eff, f_out_p), lambda i, r, k, nk: (i, 0)),
            scratch_shapes=[
                pltpu.VMEM((t_dst_eff, f_in_p), jnp.float32),
                pltpu.VMEM((t_dst_eff, 1), jnp.float32),
            ],
        ),
        compiler_params=pltpu.CompilerParams(
            dimension_semantics=("parallel", "arbitrary", "arbitrary"),
            vmem_limit_bytes=48 * 1024 * 1024,   # <= v7x's 64 MiB VMEM per TC
        ),
    )(nk_arr, adj_stack, xsrc_stack, xdst, wn_stack, ws_sum, b_sum)

    return out_p[:n_dst, :f_out]


def rsage_layer_forward(graph, h_dict, params):
    """graph : {rel: (src_type, dst_type, dense_adj (n_dst, n_src), 0/1 valued)}
       h_dict: {node_type: (n_nodes, in_feat)}
       params: {rel: (W_neigh (in,out), W_self (in,out), bias (1,out))}"""
    groups = {}
    for rel, (stype, dtype_, adj) in graph.items():
        groups.setdefault(dtype_, []).append((rel, stype, adj))

    out = {}
    for dtype_, rels in groups.items():
        f_in = h_dict[dtype_].shape[1]
        f_out = params[rels[0][0]][0].shape[1]
        res = _sage_dst_group(rels, h_dict[dtype_], h_dict, params, f_in, f_out)
        out[dtype_] = jnp.squeeze(res)   # matches the module's h.squeeze()
    return out


def _reference(graph, h_dict, params):
    out = {}
    for rel, (stype, dtype_, adj) in graph.items():
        w_neigh, w_self, bias = params[rel]
        deg = jnp.sum(adj, axis=-1, keepdims=True)
        neigh = (adj @ h_dict[stype]) / jnp.maximum(deg, 1.0)
        r = neigh @ w_neigh + h_dict[dtype_] @ w_self + bias
        out[dtype_] = r if dtype_ not in out else out[dtype_] + r
    return {nt: jnp.squeeze(h) for nt, h in out.items()}


if __name__ == "__main__":
    in_feat, out_feat = 32, 32
    n_nodes = {"user": 16, "item": 8}
    rel_defs = [("user", "follows", "user"),
                ("user", "buys", "item"),
                ("item", "rev_buys", "user")]

    key = jax.random.PRNGKey(0)
    keys = iter(jax.random.split(key, 32))

    h_dict = {nt: jax.random.normal(next(keys), (n, in_feat), dtype=jnp.float32)
              for nt, n in n_nodes.items()}

    graph = {}
    for stype, rel, dtype_ in rel_defs:
        adj = (jax.random.uniform(next(keys), (n_nodes[dtype_], n_nodes[stype])) < 0.3)
        graph[rel] = (stype, dtype_, adj.astype(jnp.float32))

    params = {}
    for _, rel, _ in rel_defs:
        w_neigh = 0.1 * jax.random.normal(next(keys), (in_feat, out_feat), dtype=jnp.float32)
        w_self = 0.1 * jax.random.normal(next(keys), (in_feat, out_feat), dtype=jnp.float32)
        bias = 0.1 * jax.random.normal(next(keys), (1, out_feat), dtype=jnp.float32)
        params[rel] = (w_neigh, w_self, bias)

    out = rsage_layer_forward(graph, h_dict, params)
    out = jax.tree_util.tree_map(jax.block_until_ready, out)

    ref = _reference(graph, h_dict, params)
    for nt in out:
        assert out[nt].shape == ref[nt].shape, (nt, out[nt].shape, ref[nt].shape)
        # tolerance covers bf16 src features in the aggregation GEMM and the
        # approx-reciprocal degree normalisation (int8 adjacency is exact for 0/1)
        assert jnp.allclose(out[nt], ref[nt], atol=2e-2, rtol=2e-2), nt

    print("KERNEL_OK")
</pallas_src>

<mosaic_0001>
module attributes {stable_mosaic.version = 11 : i64} {
  func.func @_rsage_group_kernel(%arg0: i32, %arg1: i32, %arg2: i32, %arg3: memref<2xi32, #tpu.memory_space<smem>>, %arg4: memref<1x32x128xi8, #tpu.memory_space<vmem>>, %arg5: memref<1x128x128xbf16, #tpu.memory_space<vmem>>, %arg6: memref<32x128xf32, #tpu.memory_space<vmem>>, %arg7: memref<2x128x128xf32, #tpu.memory_space<vmem>>, %arg8: memref<128x128xf32, #tpu.memory_space<vmem>>, %arg9: memref<1x128xf32, #tpu.memory_space<vmem>>, %arg10: memref<32x128xf32, #tpu.memory_space<vmem>>, %arg11: memref<32x128xf32, #tpu.memory_space<vmem>>, %arg12: memref<32x1xf32, #tpu.memory_space<vmem>>) attributes {dimension_semantics = [#tpu.dimension_semantics<parallel>, #tpu.dimension_semantics<arbitrary>, #tpu.dimension_semantics<arbitrary>], iteration_bounds = array<i64: 1, 2, 1>, scalar_prefetch = 1 : i64, scratch_operands = 2 : i64, tpu.core_type = #tpu.core_type<tc>, window_params = [{transform_indices = @transform_0, window_bounds = array<i64: 1, 32, 128>}, {transform_indices = @transform_1, window_bounds = array<i64: 1, 128, 128>}, {transform_indices = @transform_2, window_bounds = array<i64: 32, 128>}, {pipeline_mode = #tpu.pipeline_mode<synchronous>, transform_indices = @transform_3, window_bounds = array<i64: 2, 128, 128>}, {pipeline_mode = #tpu.pipeline_mode<synchronous>, transform_indices = @transform_4, window_bounds = array<i64: 128, 128>}, {pipeline_mode = #tpu.pipeline_mode<synchronous>, transform_indices = @transform_5, window_bounds = array<i64: 1, 128>}, {transform_indices = @transform_6, window_bounds = array<i64: 32, 128>}]} {
    %0 = arith.index_cast %arg1 : i32 to index
    %1 = memref.load %arg3[%0] : memref<2xi32, #tpu.memory_space<smem>>
    %c0_i32 = arith.constant 0 : i32
    %2 = arith.cmpi eq, %arg1, %c0_i32 : i32
    %c0_i32_0 = arith.constant 0 : i32
    %3 = arith.cmpi eq, %arg2, %c0_i32_0 : i32
    %4 = arith.andi %2, %3 : i1
    %5 = arith.extui %4 : i1 to i32
    %c0_i32_1 = arith.constant 0 : i32
    %6 = arith.cmpi ne, %5, %c0_i32_1 : i32
    scf.if %6 {
      %c0 = arith.constant 0 : index
      %c0_7 = arith.constant 0 : index
      %19 = vector.load %arg6[%c0, %c0_7] : memref<32x128xf32, #tpu.memory_space<vmem>>, vector<32x128xf32>
      %c0_8 = arith.constant 0 : index
      %c0_9 = arith.constant 0 : index
      %20 = vector.load %arg8[%c0_8, %c0_9] : memref<128x128xf32, #tpu.memory_space<vmem>>, vector<128x128xf32>
      %cst = arith.constant dense<0.000000e+00> : vector<32x128xf32>
      %21 = tpu.matmul %19, %20, %cst {dimension_numbers = #tpu.dot_dimension_numbers<[1], [0], [0], [1], [0, 0, 1, 1], [], []>} : vector<32x128xf32>, vector<128x128xf32>, vector<32x128xf32> -> vector<32x128xf32>
      %c0_10 = arith.constant 0 : index
      %c0_11 = arith.constant 0 : index
      %22 = vector.load %arg9[%c0_10, %c0_11] : memref<1x128xf32, #tpu.memory_space<vmem>>, vector<1x128xf32>
      %23 = vector.broadcast %22 : vector<1x128xf32> to vector<32x128xf32>
      %24 = arith.addf %21, %23 : vector<32x128xf32>
      %c0_12 = arith.constant 0 : index
      %c0_13 = arith.constant 0 : index
      %25 = vector.load %arg10[%c0_12, %c0_13] : memref<32x128xf32, #tpu.memory_space<vmem>>, vector<32x128xf32>
      tpu.vector_store %arg10[%c0_12, %c0_13], %24 {strides = array<i32>} : memref<32x128xf32, #tpu.memory_space<vmem>>, vector<32x128xf32>,
    } else {
    }
    %c0_i32_2 = arith.constant 0 : i32
    %7 = arith.cmpi eq, %arg2, %c0_i32_2 : i32
    %8 = arith.extui %7 : i1 to i32
    %c0_i32_3 = arith.constant 0 : i32
    %9 = arith.cmpi ne, %8, %c0_i32_3 : i32
    scf.if %9 {
      %c0 = arith.constant 0 : index
      %c0_7 = arith.constant 0 : index
      %c0_8 = arith.constant 0 : index
      %19 = vector.load %arg4[%c0, %c0_7, %c0_8] : memref<1x32x128xi8, #tpu.memory_space<vmem>>, vector<1x32x128xi8>
      %20 = vector.shape_cast %19 : vector<1x32x128xi8> to vector<32x128xi8>
      %21 = arith.sitofp %20 : vector<32x128xi8> to vector<32x128xf32>
      %22 = arith.truncf %21 : vector<32x128xf32> to vector<32x128xbf16>
      %c0_9 = arith.constant 0 : index
      %c0_10 = arith.constant 0 : index
      %c0_11 = arith.constant 0 : index
      %23 = vector.load %arg5[%c0_9, %c0_10, %c0_11] : memref<1x128x128xbf16, #tpu.memory_space<vmem>>, vector<1x128x128xbf16>
      %24 = vector.shape_cast %23 : vector<1x128x128xbf16> to vector<128x128xbf16>
      %cst = arith.constant dense<0.000000e+00> : vector<32x128xf32>
      %25 = tpu.matmul %22, %24, %cst {dimension_numbers = #tpu.dot_dimension_numbers<[1], [0], [0], [1], [0, 0, 1, 1], [], []>} : vector<32x128xbf16>, vector<128x128xbf16>, vector<32x128xf32> -> vector<32x128xf32>
      %cst_12 = arith.constant dense<0.000000e+00> : vector<32xf32>
      %26 = vector.multi_reduction <add>, %21, %cst_12 [1] : vector<32x128xf32> to vector<32xf32>
      %27 = vector.shape_cast %26 : vector<32xf32> to vector<32x1xf32>
      %c0_13 = arith.constant 0 : index
      %c0_14 = arith.constant 0 : index
      %28 = vector.load %arg11[%c0_13, %c0_14] : memref<32x128xf32, #tpu.memory_space<vmem>>, vector<32x128xf32>
      tpu.vector_store %arg11[%c0_13, %c0_14], %25 {strides = array<i32>} : memref<32x128xf32, #tpu.memory_space<vmem>>, vector<32x128xf32>,
      %c0_15 = arith.constant 0 : index
      %c0_16 = arith.constant 0 : index
      %29 = vector.load %arg12[%c0_15, %c0_16] : memref<32x1xf32, #tpu.memory_space<vmem>>, vector<32x1xf32>
      tpu.vector_store %arg12[%c0_15, %c0_16], %27 {strides = array<i32>} : memref<32x1xf32, #tpu.memory_space<vmem>>, vector<32x1xf32>,
    } else {
    }
    %c0_i32_4 = arith.constant 0 : i32
    %10 = arith.cmpi sgt, %arg2, %c0_i32_4 : i32
    %11 = arith.cmpi slt, %arg2, %1 : i32
    %12 = arith.andi %10, %11 : i1
    %13 = arith.extui %12 : i1 to i32
    %c0_i32_5 = arith.constant 0 : i32
    %14 = arith.cmpi ne, %13, %c0_i32_5 : i32
    scf.if %14 {
      %c0 = arith.constant 0 : index
      %c0_7 = arith.constant 0 : index
      %c0_8 = arith.constant 0 : index
      %19 = vector.load %arg4[%c0, %c0_7, %c0_8] : memref<1x32x128xi8, #tpu.memory_space<vmem>>, vector<1x32x128xi8>
      %20 = vector.shape_cast %19 : vector<1x32x128xi8> to vector<32x128xi8>
      %21 = arith.sitofp %20 : vector<32x128xi8> to vector<32x128xf32>
      %22 = arith.truncf %21 : vector<32x128xf32> to vector<32x128xbf16>
      %c0_9 = arith.constant 0 : index
      %c0_10 = arith.constant 0 : index
      %c0_11 = arith.constant 0 : index
      %23 = vector.load %arg5[%c0_9, %c0_10, %c0_11] : memref<1x128x128xbf16, #tpu.memory_space<vmem>>, vector<1x128x128xbf16>
      %24 = vector.shape_cast %23 : vector<1x128x128xbf16> to vector<128x128xbf16>
      %cst = arith.constant dense<0.000000e+00> : vector<32x128xf32>
      %25 = tpu.matmul %22, %24, %cst {dimension_numbers = #tpu.dot_dimension_numbers<[1], [0], [0], [1], [0, 0, 1, 1], [], []>} : vector<32x128xbf16>, vector<128x128xbf16>, vector<32x128xf32> -> vector<32x128xf32>
      %cst_12 = arith.constant dense<0.000000e+00> : vector<32xf32>
      %26 = vector.multi_reduction <add>, %21, %cst_12 [1] : vector<32x128xf32> to vector<32xf32>
      %27 = vector.shape_cast %26 : vector<32xf32> to vector<32x1xf32>
      %c0_13 = arith.constant 0 : index
      %c0_14 = arith.constant 0 : index
      %28 = vector.load %arg11[%c0_13, %c0_14] : memref<32x128xf32, #tpu.memory_space<vmem>>, vector<32x128xf32>
      %29 = arith.addf %28, %25 : vector<32x128xf32>
      %c0_15 = arith.constant 0 : index
      %c0_16 = arith.constant 0 : index
      %30 = vector.load %arg11[%c0_15, %c0_16] : memref<32x128xf32, #tpu.memory_space<vmem>>, vector<32x128xf32>
      tpu.vector_store %arg11[%c0_15, %c0_16], %29 {strides = array<i32>} : memref<32x128xf32, #tpu.memory_space<vmem>>, vector<32x128xf32>,
      %c0_17 = arith.constant 0 : index
      %c0_18 = arith.constant 0 : index
      %31 = vector.load %arg12[%c0_17, %c0_18] : memref<32x1xf32, #tpu.memory_space<vmem>>, vector<32x1xf32>
      %32 = arith.addf %31, %27 : vector<32x1xf32>
      %c0_19 = arith.constant 0 : index
      %c0_20 = arith.constant 0 : index
      %33 = vector.load %arg12[%c0_19, %c0_20] : memref<32x1xf32, #tpu.memory_space<vmem>>, vector<32x1xf32>
      tpu.vector_store %arg12[%c0_19, %c0_20], %32 {strides = array<i32>} : memref<32x1xf32, #tpu.memory_space<vmem>>, vector<32x1xf32>,
    } else {
    }
    %c1_i32 = arith.constant 1 : i32
    %15 = arith.subi %1, %c1_i32 : i32
    %16 = arith.cmpi eq, %arg2, %15 : i32
    %17 = arith.extui %16 : i1 to i32
    %c0_i32_6 = arith.constant 0 : i32
    %18 = arith.cmpi ne, %17, %c0_i32_6 : i32
    scf.if %18 {
      %c0 = arith.constant 0 : index
      %c0_7 = arith.constant 0 : index
      %19 = vector.load %arg12[%c0, %c0_7] : memref<32x1xf32, #tpu.memory_space<vmem>>, vector<32x1xf32>
      %cst = arith.constant 1.000000e+00 : f32
      %20 = vector.broadcast %cst : f32 to vector<32x1xf32>
      %21 = arith.maximumf %19, %20 : vector<32x1xf32>
      %22 = tpu.reciprocal %21 {approx = true} : vector<32x1xf32> -> vector<32x1xf32>
      %c0_8 = arith.constant 0 : index
      %c0_9 = arith.constant 0 : index
      %23 = vector.load %arg11[%c0_8, %c0_9] : memref<32x128xf32, #tpu.memory_space<vmem>>, vector<32x128xf32>
      %24 = vector.broadcast %22 : vector<32x1xf32> to vector<32x128xf32>
      %25 = arith.mulf %23, %24 : vector<32x128xf32>
      %26 = arith.index_cast %arg1 : i32 to index
      %c0_10 = arith.constant 0 : index
      %c0_11 = arith.constant 0 : index
      %27 = vector.load %arg7[%26, %c0_10, %c0_11] : memref<2x128x128xf32, #tpu.memory_space<vmem>>, vector<1x128x128xf32>
      %28 = vector.shape_cast %27 : vector<1x128x128xf32> to vector<128x128xf32>
      %c0_12 = arith.constant 0 : index
      %c0_13 = arith.constant 0 : index
      %29 = vector.load %arg10[%c0_12, %c0_13] : memref<32x128xf32, #tpu.memory_space<vmem>>, vector<32x128xf32>
      %cst_14 = arith.constant dense<0.000000e+00> : vector<32x128xf32>
      %30 = tpu.matmul %25, %28, %cst_14 {dimension_numbers = #tpu.dot_dimension_numbers<[1], [0], [0], [1], [0, 0, 1, 1], [], []>} : vector<32x128xf32>, vector<128x128xf32>, vector<32x128xf32> -> vector<32x128xf32>
      %31 = arith.addf %29, %30 : vector<32x128xf32>
      %c0_15 = arith.constant 0 : index
      %c0_16 = arith.constant 0 : index
      %32 = vector.load %arg10[%c0_15, %c0_16] : memref<32x128xf32, #tpu.memory_space<vmem>>, vector<32x128xf32>
      tpu.vector_store %arg10[%c0_15, %c0_16], %31 {strides = array<i32>} : memref<32x128xf32, #tpu.memory_space<vmem>>, vector<32x128xf32>,
    } else {
    }
    return
  }
  func.func @transform_0(%arg0: i32, %arg1: i32, %arg2: i32, %arg3: memref<2xi32, #tpu.memory_space<smem>>) -> (i32, i32, i32) {
    %0 = arith.index_cast %arg1 : i32 to index
    %1 = memref.load %arg3[%0] : memref<2xi32, #tpu.memory_space<smem>>
    %c1_i32 = arith.constant 1 : i32
    %2 = arith.subi %1, %c1_i32 : i32
    %3 = arith.minsi %arg2, %2 : i32
    %c0_i32 = arith.constant 0 : i32
    return %arg1, %arg0, %3 : i32, i32, i32
  }
  func.func @transform_1(%arg0: i32, %arg1: i32, %arg2: i32, %arg3: memref<2xi32, #tpu.memory_space<smem>>) -> (i32, i32, i32) {
    %0 = arith.index_cast %arg1 : i32 to index
    %1 = memref.load %arg3[%0] : memref<2xi32, #tpu.memory_space<smem>>
    %c1_i32 = arith.constant 1 : i32
    %2 = arith.subi %1, %c1_i32 : i32
    %3 = arith.minsi %arg2, %2 : i32
    %c0_i32 = arith.constant 0 : i32
    %c0_i32_0 = arith.constant 0 : i32
    return %arg1, %3, %c0_i32 : i32, i32, i32
  }
  func.func @transform_2(%arg0: i32, %arg1: i32, %arg2: i32, %arg3: memref<2xi32, #tpu.memory_space<smem>>) -> (i32, i32) {
    %c0_i32 = arith.constant 0 : i32
    %c0_i32_0 = arith.constant 0 : i32
    return %arg0, %c0_i32 : i32, i32
  }
  func.func @transform_3(%arg0: i32, %arg1: i32, %arg2: i32, %arg3: memref<2xi32, #tpu.memory_space<smem>>) -> (i32, i32, i32) {
    %c0_i32 = arith.constant 0 : i32
    %c0_i32_0 = arith.constant 0 : i32
    %c0_i32_1 = arith.constant 0 : i32
    %c0_i32_2 = arith.constant 0 : i32
    return %c0_i32, %c0_i32_0, %c0_i32_1 : i32, i32, i32
  }
  func.func @transform_4(%arg0: i32, %arg1: i32, %arg2: i32, %arg3: memref<2xi32, #tpu.memory_space<smem>>) -> (i32, i32) {
    %c0_i32 = arith.constant 0 : i32
    %c0_i32_0 = arith.constant 0 : i32
    %c0_i32_1 = arith.constant 0 : i32
    return %c0_i32, %c0_i32_0 : i32, i32
  }
  func.func @transform_5(%arg0: i32, %arg1: i32, %arg2: i32, %arg3: memref<2xi32, #tpu.memory_space<smem>>) -> (i32, i32) {
    %c0_i32 = arith.constant 0 : i32
    %c0_i32_0 = arith.constant 0 : i32
    %c0_i32_1 = arith.constant 0 : i32
    return %c0_i32, %c0_i32_0 : i32, i32
  }
  func.func @transform_6(%arg0: i32, %arg1: i32, %arg2: i32, %arg3: memref<2xi32, #tpu.memory_space<smem>>) -> (i32, i32) {
    %c0_i32 = arith.constant 0 : i32
    %c0_i32_0 = arith.constant 0 : i32
    return %arg0, %c0_i32 : i32, i32
  }
}

</mosaic_0001>

<bundles_post_ra>
// kernel: tpu_custom_call.1
= control target key start
LH: loop header
LB: loop body
LE: loop exit
PB: predicated region body
PF: predicated region fallthrough
CT: control target
= control target key end

     0   :  { %s2365_s0 = inlined_call_operand.hbm [shape: s32[2], index: 0, kind: input, shape index: {}]   ;;  %s2366_s1 = inlined_call_operand.hbm [shape: s8[2,32,128], index: 1, kind: input, shape index: {}]   ;;  %s2367_s2 = inlined_call_operand.hbm [shape: bf16[2,128,128], index: 2, kind: input, shape index: {}]   ;;  %s2368_s3 = inlined_call_operand.hbm [shape: f32[32,128], index: 3, kind: input, shape index: {}]   ;;  %s2369_s4 = inlined_call_operand.hbm [shape: f32[2,128,128], index: 4, kind: input, shape index: {}]   ;;  %s2370_s5 = inlined_call_operand.hbm [shape: f32[128,128], index: 5, kind: input, shape index: {}]   ;;  %s2371_s6 = inlined_call_operand.vmem [shape: f32[1,128], index: 6, kind: input, shape index: {}]   ;;  %s2372_s7 = inlined_call_operand.hbm [shape: f32[32,128], index: 7, kind: output, shape index: {}]  }
   0x1   :  { %2380 = sst [smem:[#allocation28_spill]] %s2368_s3  ;;  %s1603_s26 = scalar_lea.hbm %s2365_s0, 16 }
   0x2   :  { %2381 = sst [smem:[#allocation29_spill]] %s2369_s4  ;;  %p1604_p0 = scmp.ne.s32.totalorder %s2365_s0, %s1603_s26 }
   0x3   :  { %2382 = sst [smem:[#allocation30_spill]] %s2370_s5  ;;  %p1607_p1 = scmp.lt.u32.totalorder %s1603_s26, %s2365_s0 }
   0x4   :  { %2383 = sst [smem:[#allocation31_spill]] %s2371_s6 }
   0x5   :  { %2384 = sst [smem:[#allocation32_spill]] %s2372_s7  ;;  %p1609_p2 = pnand %p1607_p1, %p1604_p0 }
   0x7   :  { %1612 = shalt.err (!%p1609_p2)  }
   0x8   :  { %s1877_s8 = smov [#allocation5]  }
   0x9   :  { %13 = dma.hbm_to_smem %s2365_s0, 16, %s1877_s8, [#allocation4] }
   0xa   :  { %1819 = dma.done.wait [#allocation4], 16 }
   0xb   :  { %1820 = vsyncadd [#allocation4], 4294967280 }
   0xc   :  { %15 = sfence }
   0xd   :  { %16 = vsyncpa [#allocation7], 0 }
   0xe   :  { %18 = vsyncpa [#allocation7 + $0x1], 0 }
   0xf   :  { %19 = vsyncpa [#allocation10], 0 }
  0x10   :  { %21 = vsyncpa [#allocation10 + $0x1], 0 }
  0x11   :  { %22 = vsyncpa [#allocation13], 0 }
  0x12   :  { %23 = vsyncpa [#allocation8], 0  ;;  %s1943_s11 = smov 0   ;;  %s1945_s12 = smov 0  }
  0x13   :  { %s1947_s13 = smov 0   ;;  %s1949_s14 = smov 0  }
  0x14   :  { %s1951_s15 = smov 0   ;;  %s1953_s0 = smov 0  }
  0x15   :  { %s1955_s16 = smov 0   ;;  %s1957_s17 = smov 0  }
  0x16   :  { %s1959_s18 = smov 0  }
  0x17 LB: > { %2385 = sst [smem:[#allocation26_spill]] %s1867_s16  ;;  %s1987_s19 = sadd.s32 4294967295, %s1875_s18   ;;  %s1875_s18 = sphi %s1959_s18, %s29_s18   ;;  %s1871_s17 = sphi %s1957_s17, %s2419_s17   ;;  %s1867_s16 = sphi %s1955_s16, %s2418_s16   ;;  %s1863_s0 = sphi %s1953_s0, %s2417_s0   ;;  %s1859_s15 = sphi %s1951_s15, %s2416_s15   ;;  %s1855_s14 = sphi %s1949_s14, %s2415_s14   ;;  %s1851_s13 = sphi %s1947_s13, %s2414_s13   ;;  %s1847_s12 = sphi %s1945_s12, %s2413_s12   ;;  %s1843_s11 = sphi %s1943_s11, %s2412_s11  }
  0x18   : > { %p116_p3 = scmp.ne.s32.totalorder %s1847_s12, %s1843_s11  ;;  %p2373_p4 = scmp.eq.s32.totalorder %s1987_s19, 0 }
  0x19   : > { %p1156_p5 = scmp.ge.s32.totalorder %s1875_s18, 1  ;;  %p242_p6 = scmp.lt.s32.totalorder %s1875_s18, 3 }
  0x1a   : > { %p1995_p7 = por %p116_p3, %p2373_p4  ;;  %s1878_s22 = smov [#allocation11]  }
  0x1b   : > { %p1999_p8 = pnand %p1156_p5, %p242_p6  ;;  %s257_s23 = sshll.u32 %s1878_s22, 4  ;;  %s2003_s23 = int_to_ptr.vmem [resolvable:$true] %s257_s23 }
  0x1c   : > { %s2386_s20 = scalar_select %p1995_p7, 1, 0 }
  0x1d   : > { %s2387_s21 = scalar_select %p1999_p8, 1, 0 }
  0x1e   : > { %p1471_p9 = pneg %p1999_p8  ;;  %s1879_s25 = smov [#allocation12]  }
  0x1f   : > { %s270_s26 = sshll.u32 %s1879_s25, 4  ;;  %s1880_s27 = smov [#allocation14]   ;;  %s2013_s26 = int_to_ptr.vmem [resolvable:$true] %s270_s26 }
  0x20   : > { %p2009_p10 = pnand %p1471_p9, %p2373_p4  ;;  %s2015_s28 = sshll.u32 %s1880_s27, 4  ;;  %s284_s28 = int_to_ptr.vmem [resolvable:$true] %s2015_s28 }
  0x21   : > { %s2389_s3 = sld [smem:[#allocation28_spill]] }
  0x22   : > { %p2025_p12 = pneg %p2009_p10 }
  0x27   : > { %s1613_s8 = scalar_lea.hbm %s2389_s3, 512 }
  0x28   : > { %p1614_p11 = scmp.ne.s32.totalorder %s2389_s3, %s1613_s8  ;;  %p1620_p1 = scmp.lt.u32.totalorder %s1613_s8, %s2389_s3 }
  0x2a   : > { %p1616_p13 = pnand %p2025_p12, %p1614_p11 }
  0x2c   : > { %p1617_p0 = pneg %p1616_p13 }
  0x2e   : > { %p1622_p2 = pnand %p1620_p1, %p1617_p0 }
  0x30   : > { %1625 = shalt.err (!%p1622_p2)
}
  0x31   : > { %s1626_s27 = scalar_lea.vmem %s2003_s23, 512  ;;  %p1634_p9 = scmp.lt.s32.totalorder %s2003_s23, %s2003_s23 }
  0x32   : > { %p1627_p3 = scmp.ne.s32.totalorder %s2003_s23, %s1626_s27  ;;  %p1635_p4 = scmp.lt.s32.totalorder %s1626_s27, %s1626_s27 }
  0x34   : > { %p1629_p5 = pnand %p1627_p3, %p2025_p12  ;;  %p1636_p11 = por %p1635_p4, %p1634_p9 }
  0x36   : > { %p1630_p6 = pneg %p1629_p5 }
  0x38   : > { %p1637_p13 = pnand %p1636_p11, %p1630_p6 }
  0x3a   : > { %1640 = shalt.err (!%p1637_p13)
}
  0x3b   : > { %s1881_s29 = smov 128   ;;  %s1882_s30 = smov 8  }
  0x3c   : > { %1474 = dma.hbm_to_vmem [thread:$0]  (!%p2009_p10), %s2389_s3, 512, %s2003_s23, [#allocation10], %s1881_s29, %s1881_s29, %s1882_s30  }
  0x3d   : > { %s2391_s4 = sld [smem:[#allocation29_spill]] }
  0x43   : > { %s1641_s25 = scalar_lea.hbm %s2391_s4, 4096 }
  0x44   : > { %p1642_p4 = scmp.ne.s32.totalorder %s2391_s4, %s1641_s25  ;;  %p1648_p2 = scmp.lt.u32.totalorder %s1641_s25, %s2391_s4 }
  0x46   : > { %p1644_p0 = pnand %p1642_p4, %p2025_p12 }
  0x48   : > { %p1645_p1 = pneg %p1644_p0 }
  0x4a   : > { %p1650_p3 = pnand %p1648_p2, %p1645_p1 }
  0x4c   : > { %1653 = shalt.err (!%p1650_p3)
}
  0x4d   : > { %s1654_s23 = scalar_lea.vmem %s2013_s26, 4096  ;;  %p1662_p11 = scmp.lt.s32.totalorder %s2013_s26, %s2013_s26 }
  0x4e   : > { %p1655_p5 = scmp.ne.s32.totalorder %s2013_s26, %s1654_s23  ;;  %p1663_p13 = scmp.lt.s32.totalorder %s1654_s23, %s1654_s23 }
  0x50   : > { %p1657_p6 = pnand %p1655_p5, %p2025_p12  ;;  %p1664_p4 = por %p1663_p13, %p1662_p11 }
  0x52   : > { %p1658_p9 = pneg %p1657_p6 }
  0x54   : > { %p1665_p0 = pnand %p1664_p4, %p1658_p9 }
  0x56   : > { %1668 = shalt.err (!%p1665_p0)
}
  0x57   : > { %1477 = dma.hbm_to_vmem [thread:$0]  (!%p2009_p10), %s2391_s4, 4096, %s2013_s26, [#allocation13], %s1881_s29, %s1881_s29, %s1882_s30  }
  0x58   : > { %s2392_s5 = sld [smem:[#allocation30_spill]] }
  0x5e   : > { %s1669_s9 = scalar_lea.hbm %s2392_s5, 2048 }
  0x5f   : > { %p1670_p1 = scmp.ne.s32.totalorder %s2392_s5, %s1669_s9  ;;  %p1676_p5 = scmp.lt.u32.totalorder %s1669_s9, %s2392_s5 }
  0x61   : > { %p1672_p2 = pnand %p1670_p1, %p2025_p12 }
  0x63   : > { %p1673_p3 = pneg %p1672_p2 }
  0x65   : > { %p1678_p6 = pnand %p1676_p5, %p1673_p3 }
  0x67   : > { %1681 = shalt.err (!%p1678_p6)
}
  0x68   : > { %s1682_s23 = scalar_lea.vmem %s284_s28, 2048  ;;  %p1690_p4 = scmp.lt.s32.totalorder %s284_s28, %s284_s28 }
  0x69   : > { %p1683_p9 = scmp.ne.s32.totalorder %s284_s28, %s1682_s23  ;;  %p1691_p0 = scmp.lt.s32.totalorder %s1682_s23, %s1682_s23 }
  0x6b   : > { %p1685_p11 = pnand %p1683_p9, %p2025_p12  ;;  %p1692_p7 = por %p1691_p0, %p1690_p4 }
  0x6d   : > { %p1686_p13 = pneg %p1685_p11 }
  0x6f   : > { %p1693_p8 = pnand %p1692_p7, %p1686_p13 }
  0x71   : > { %1696 = shalt.err (!%p1693_p8)
}
  0x72   : > { %1480 = dma.hbm_to_vmem [thread:$0]  (!%p2009_p10), %s2392_s5, 2048, %s284_s28, [#allocation13], %s1881_s29, %s1881_s29, %s1882_s30  }
  0x73   : > { %s44_s11 = sadd.s32 1, %s1871_s17  ;;  %s52_s24 = sld [smem:[#allocation5 + %s1871_s17]] }
  0x74   : > { %p46_p7 = scmp.ge.s32.totalorder %s44_s11, 2  ;;  %p80_p8 = scmp.ne.s32.totalorder %s1859_s15, %s1855_s14 }
  0x75   : > { %p2394_p12 = scmp.eq.s32.totalorder %s1987_s19, 0  ;;  %s90_s28 = sld [smem:[#allocation5 + %s1871_s17]] }
  0x76   : > { %s2421_s11 = smov (%p46_p7, %s44_s11), 0  ;;  %p74_p2 = scmp.ne.s32.totalorder %s1863_s0, %s1859_s15 }
  0x77   : > { %2393 = sst [smem:[#allocation27_spill]] %s2421_s11  ;;  %p2106_p1 = por %p2394_p12, %p80_p8 }
  0x78   : > { %s56_s7 = sld [smem:[#allocation5 + %s2421_s11]]  ;;  %p75_p3 = scmp.eq.s32.totalorder %s1875_s18, 0 }
  0x79   : > { %s2395_s16 = scalar_select %p2106_p1, 1, 0 }
  0x7a   : > { %s1148_s8 = sadd.s32 4294967295, %s52_s24  ;;  %s94_s29 = sld [smem:[#allocation5 + %s2421_s11]] }
  0x7b   : > { %p1149_p10 = scmp.gt.s32.totalorder %s1148_s8, 0  ;;  %s67_s9 = sadd.s32 1, %s1863_s0 }
  0x7c   : > { %s60_s14 = ssub.s32 %s1871_s17, %s2421_s11  ;;  %p2120_p6 = por %p75_p3, %p74_p2 }
  0x7d   : > { %s2423_s8 = smov (%p1149_p10, %s1148_s8), 0  ;;  %s1152_s22 = sadd.s32 4294967295, %s90_s28 }
  0x7e   : > { %s1150_s30 = sadd.s32 4294967295, %s56_s7  ;;  %p1153_p9 = scmp.gt.s32.totalorder %s1152_s22, 0 }
  0x7f   : > { %p1151_p5 = scmp.gt.s32.totalorder %s1150_s30, 0  ;;  %p110_p11 = scmp.ne.s32.totalorder %s1851_s13, %s1847_s12 }
  0x80   : > { %s1154_s25 = sadd.s32 4294967295, %s94_s29  ;;  %p1495_p0 = scmp.lt.s32.totalorder %s1875_s18, 2 }
  0x81   : > { %s2425_s30 = smov (%p1151_p5, %s1150_s30), 0  ;;  %p1155_p13 = scmp.gt.s32.totalorder %s1154_s25, 0 }
  0x82   : > { %s63_s27 = ssub.s32 %s2423_s8, %s2425_s30  ;;  %s2427_s22 = smov (%p1153_p9, %s1152_s22), 0 }
  0x83   : > { %s64_s23 = sor.u32 %s63_s27, %s60_s14  ;;  %s2429_s25 = smov (%p1155_p13, %s1154_s25), 0 }
  0x84   : > { %p65_p4 = scmp.eq.s32.totalorder %s64_s23, 0  ;;  %s103_s6 = sadd.s32 1, %s1851_s13 }
  0x85   : > { %p2135_p7 = pnand %p1495_p0, %p2120_p6  ;;  %s99_s7 = ssub.s32 %s2427_s22, %s2429_s25 }
  0x86   : > { %s2128_s26 = scalar_select %p65_p4, %s1863_s0, %s67_s9  }
  0x87   : > { %p2141_p8 = por %p110_p11, %p75_p3  ;;  %s100_s28 = sor.u32 %s99_s7, %s60_s14 }
  0x88   : > { %s300_s29 = sand.u32 1, %s1863_s0   ;;  %p101_p12 = scmp.eq.s32.totalorder %s100_s28, 0 }
  0x89   : > { %s1453_s30 = scalar_select %p2120_p6, [#allocation5], [#allocation16] }
  0x8a   : > { %s2149_s9 = scalar_select %p101_p12, %s1851_s13, %s103_s6  }
  0x8b   : > { %s1454_s22 = scalar_select %p2120_p6, %s1871_s17, 0 }
  0x8c   : > { %s2431_s30 = smov (!%p1495_p0, %s1453_s30), [#allocation18]  ;;  %p2162_p10 = pnand %p1495_p0, %p2141_p8 }
  0x8d   : > { %s2433_s22 = smov (!%p1495_p0, %s1454_s22), 0  ;;  %s1161_s25 = sshll.u32 %s300_s29, 3 }
  0x8e   : > { %s305_s27 = sld [smem:[%s2431_s30 + %s2433_s22]]  ;;  %s304_s7 = scalar_lea.vmem [#allocation6], %s1161_s25 }
  0x8f   : > { %s1456_s23 = scalar_select %p2141_p8, [#allocation5], [#allocation17] }
  0x90   : > { %s1457_s6 = scalar_select %p2141_p8, %s1871_s17, 0 }
  0x91   : > { %s317_s28 = sshll.u32 %s304_s7, 4  ;;  %s326_s3 = sand.u32 1, %s1851_s13   ;;  %s2177_s28 = int_to_ptr.vmem [resolvable:$true] %s317_s28 }
  0x92   : > { %s2435_s23 = smov (!%p1495_p0, %s1456_s23), [#allocation19]  ;;  %s2439_s6 = smov (!%p1495_p0, %s1457_s6), 0 }
  0x93   : > { %s2179_s22 = sld [smem:[%s2435_s23 + %s2439_s6]]  ;;  %s301_s7 = scalar_lea.sflag [#allocation7], %s300_s29 }
  0x94   : > { %s1162_s10 = sadd.s32 4294967295, %s305_s27  ;;  %s2186_s27 = sshll.u32 %s326_s3, 6 }
  0x95   : > { %p1163_p2 = scmp.gt.s32.totalorder %s1162_s10, 0  ;;  %p1699_p5 = pneg %p2135_p7 }
  0x96   : > { %s1702_s5 = scalar_lea.hbm %s2366_s1, 256 }
  0x97   : > { %s2437_s10 = smov (%p1163_p2, %s1162_s10), 0 }
  0x98   : > { %s313_s4 = sadd.s32 %s1871_s17, %s2437_s10 }
  0x99   : > { %s1164_s30 = sshll.u32 %s313_s4, 7 }
  0x9a   : > { %s2184_s25 = scalar_lea.hbm %s2366_s1, %s1164_s30 }
  0x9b   : > { %s1697_s11 = scalar_lea.hbm %s2184_s25, 128  ;;  %p1703_p11 = scmp.lt.u32.totalorder %s2184_s25, %s2366_s1 }
  0x9c   : > { %p1698_p3 = scmp.ne.s32.totalorder %s2184_s25, %s1697_s11  ;;  %p1704_p13 = scmp.lt.u32.totalorder %s1702_s5, %s1697_s11 }
  0x9d   : > { %p1706_p0 = scmp.lt.u32.totalorder %s1697_s11, %s2184_s25 }
  0x9e   : > { %p1700_p6 = pnand %p1699_p5, %p1698_p3  ;;  %p1705_p4 = por %p1704_p13, %p1703_p11 }
  0xa0   : > { %p1701_p9 = pneg %p1700_p6  ;;  %p1707_p8 = por %p1706_p0, %p1705_p4 }
  0xa2   : > { %p1708_p12 = pnand %p1707_p8, %p1701_p9 }
  0xa4   : > { %1711 = shalt.err (!%p1708_p12)
}
  0xa5   : > { %s1712_s3 = scalar_lea.vmem %s2177_s28, 128  ;;  %s1883_s29 = smov [#allocation6]  }
  0xa6   : > { %p1713_p2 = scmp.ne.s32.totalorder %s2177_s28, %s1712_s3  ;;  %s1717_s30 = sshll.u32 %s1883_s29, 4  ;;  %s1718_s30 = int_to_ptr.vmem [resolvable:$false] %s1717_s30 }
  0xa7   : > { %s1719_s8 = scalar_lea.vmem %s1718_s30, 256  ;;  %p1720_p1 = scmp.lt.s32.totalorder %s2177_s28, %s1718_s30 }
  0xa8   : > { %p1715_p3 = pnand %p1713_p2, %p1699_p5  ;;  %p1721_p11 = scmp.lt.s32.totalorder %s1719_s8, %s1712_s3 }
  0xaa   : > { %p1716_p6 = pneg %p1715_p3  ;;  %p1722_p13 = por %p1721_p11, %p1720_p1 }
  0xac   : > { %p1723_p4 = pnand %p1722_p13, %p1716_p6 }
  0xae   : > { %1726 = shalt.err (!%p1723_p4)
}
  0xaf   : > { %1486 = dma.hbm_to_vmem [thread:$0]  (!%p2135_p7), %s2184_s25, 128, %s2177_s28, %s301_s7  }
  0xb0   : > { %s1166_s11 = sadd.s32 4294967295, %s2179_s22  ;;  %s324_s4 = sand.u32 1, %s1875_s18  }
  0xb1   : > { %p1167_p5 = scmp.gt.s32.totalorder %s1166_s11, 0  ;;  %s1169_s23 = sshll.u32 %s1871_s17, 4 }
  0xb2   : > { %s328_s5 = scalar_lea.vmem [#allocation9], %s2186_s27  ;;  %s2224_s28 = scalar_lea.sflag [#allocation10], %s324_s4 }
  0xb3   : > { %s341_s6 = sshll.u32 %s328_s5, 4  ;;  %s2441_s11 = smov (%p1167_p5, %s1166_s11), 0  ;;  %s2217_s6 = int_to_ptr.vmem [resolvable:$true] %s341_s6 }
  0xb4   : > { %s1168_s10 = sshll.u32 %s2441_s11, 4  ;;  %p1729_p7 = pneg %p2162_p10 }
  0xb5   : > { %s338_s24 = sadd.s32 %s1169_s23, %s1168_s10  ;;  %s1732_s7 = scalar_lea.hbm %s2367_s2, 2048 }
  0xb6   : > { %s1170_s3 = sshll.u32 %s338_s24, 6 }
  0xb7   : > { %s2222_s8 = scalar_lea.hbm %s2367_s2, %s1170_s3 }
  0xb8   : > { %s1727_s22 = scalar_lea.hbm %s2222_s8, 1024  ;;  %p1733_p8 = scmp.lt.u32.totalorder %s2222_s8, %s2367_s2 }
  0xb9   : > { %p1728_p1 = scmp.ne.s32.totalorder %s2222_s8, %s1727_s22  ;;  %p1734_p12 = scmp.lt.u32.totalorder %s1732_s7, %s1727_s22 }
  0xba   : > { %p1736_p3 = scmp.lt.u32.totalorder %s1727_s22, %s2222_s8 }
  0xbb   : > { %p1730_p9 = pnand %p1729_p7, %p1728_p1  ;;  %p1735_p2 = por %p1734_p12, %p1733_p8 }
  0xbd   : > { %p1731_p0 = pneg %p1730_p9  ;;  %p1737_p6 = por %p1736_p3, %p1735_p2 }
  0xbf   : > { %p1738_p11 = pnand %p1737_p6, %p1731_p0 }
  0xc1   : > { %1741 = shalt.err (!%p1738_p11)
}
  0xc2   : > { %s1742_s4 = scalar_lea.vmem %s2217_s6, 1024  ;;  %s1884_s5 = smov [#allocation9]  }
  0xc3   : > { %p1743_p13 = scmp.ne.s32.totalorder %s2217_s6, %s1742_s4  ;;  %s1747_s10 = sshll.u32 %s1884_s5, 4  ;;  %s1748_s10 = int_to_ptr.vmem [resolvable:$false] %s1747_s10 }
  0xc4   : > { %s1749_s24 = scalar_lea.vmem %s1748_s10, 2048  ;;  %p1750_p1 = scmp.lt.s32.totalorder %s2217_s6, %s1748_s10 }
  0xc5   : > { %p1745_p4 = pnand %p1743_p13, %p1729_p7  ;;  %p1751_p9 = scmp.lt.s32.totalorder %s1749_s24, %s1742_s4 }
  0xc7   : > { %p1746_p5 = pneg %p1745_p4  ;;  %p1752_p8 = por %p1751_p9, %p1750_p1 }
  0xc9   : > { %p1753_p12 = pnand %p1752_p8, %p1746_p5 }
  0xcb   : > { %1756 = shalt.err (!%p1753_p12)
}
  0xcc   : > { %s1885_s3 = smov 64   ;;  %s1886_s29 = smov 4  }
  0xcd   : > { %1491 = dma.hbm_to_vmem [thread:$0]  (!%p2162_p10), %s2222_s8, 1024, %s2217_s6, %s2224_s28, %s1885_s3, %s1885_s3, %s1886_s29  }
  0xce   : > { %p2400_p7 = scmp.ne.s32.totalorder %s2387_s21, 0 }
  0xcf   : > { %s355_s30 = sand.u32 (!%p2400_p7), 1, %s1859_s15   ;;  %p2401_p0 = scmp.ne.s32.totalorder (!%p2400_p7), %s2395_s16, 0 }
  0xd0   : > { %353 = sbr.rel (%p2400_p7) target bundleno = 1044 (0x414), region = 44  ;;  %s2255_s22 = sshll.u32 (!%p2400_p7), %s355_s30, 3 }
  0xd1   : > { %s356_s25 = scalar_lea.sflag (!%p2400_p7), [#allocation7], %s355_s30  ;;  %s359_s27 = scalar_lea.vmem (!%p2400_p7), [#allocation6], %s2255_s22 }
  0xd7   : > { %1822 = dma.done.wait (%p2401_p0), %s356_s25, 128  }
  0xd8   : > { %1824 = vsyncadd (%p2401_p0), %s356_s25, 4294967168  ;;  %s364_s14 = sand.u32 1, %s1987_s19   ;;  %s366_s6 = sand.u32 1, %s1847_s12  }
  0xd9   : > { %s1173_s21 = sshll.u32 %s366_s6, 6  ;;  %s365_s8 = scalar_lea.sflag [#allocation10], %s364_s14 }
  0xda   : > { %s2264_s28 = scalar_lea.vmem [#allocation9], %s1173_s21  ;;  %p2402_p10 = scmp.ne.s32.totalorder %s2386_s20, 0 }
  0xdc   : > { %1826 = dma.done.wait (%p2402_p10), %s365_s8, 1024  }
  0xdd   : > { %1828 = vsyncadd (%p2402_p10), %s365_s8, 4294966272  ;;  %p2403_p2 = scmp.eq.s32.totalorder %s1987_s19, 0 }
  0xdf   : > { %1830 = dma.done.wait (%p2403_p2), [#allocation10], 512   ;;  %p2404_p3 = pmov %p2403_p2 }
  0xe0   : > { %p2405_p6 = pmov %p2403_p2 }
  0xe1   : > { %1832 = vsyncadd (%p2404_p3), [#allocation10], 4294966784 }
  0xe2   : > { %1834 = dma.done.wait (%p2405_p6), [#allocation13], 6144   ;;  %p2406_p11 = pmov %p2403_p2 }
  0xe3   : > { %s2407_s16 = sld [smem:[#allocation26_spill]] }
  0xe4   : > { %1836 = vsyncadd (%p2406_p11), [#allocation13], 4294961152 }
  0xe9   : > { %p422_p13 = scmp.eq.s32.totalorder %s2407_s16, 0  ;;  %s2280_s7 = sld [smem:[#allocation5 + %s2407_s16]] }
  0xea   : > { %v432_v0 = vld [vmem:[#allocation14] sm:$0xff] (%p422_p13)  ;;  %v433_v1 = vld [vmem:[#allocation14 + $0x8] sm:$0xff] (%p422_p13)  ;;  %v434_v2 = vld [vmem:[#allocation14 + $0x10] sm:$0xff] (%p422_p13)  ;;  %s2408_s23 = sld [smem:[#allocation31_spill]] (%p422_p13) }
  0xeb   : > { %427 = sbr.rel (!%p422_p13) target bundleno = 485 (0x1e5), region = 68  ;;  %v1351_v3 = vpack.c.bf16 (%p422_p13), %v433_v1, %v432_v0  ;;  %v435_v4 = vld [vmem:[#allocation14 + $0x18] sm:$0xff] (%p422_p13)  ;;  %v436_v6 = vld [vmem:[#allocation14 + $0x20] sm:$0xff] (%p422_p13)  ;;  %v437_v7 = vld [vmem:[#allocation14 + $0x28] sm:$0xff] (%p422_p13) }
  0xec   : > { %v1355_v5 = vpack.c.bf16 (%p422_p13), %v435_v4, %v434_v2  ;;  %v1359_v8 = vpack.c.bf16 (%p422_p13), %v437_v7, %v436_v6  ;;  %v428_v9 = vld [vmem:[#allocation11] sm:$0xff] (%p422_p13)  ;;  %v430_v10 = vld [vmem:[#allocation11 + $0x10] sm:$0xff] (%p422_p13)  ;;  %v439_v12 = vld [vmem:[#allocation14 + $0x38] sm:$0xff] (%p422_p13) }
  0xed   : > { %1352 = vmatprep.subr.bf16.mxu0 (%p422_p13), %v1351_v3  ;;  %1415 = vmatprep.subr.bf16.mxu1 (%p422_p13), %v1351_v3  ;;  %v438_v11 = vld [vmem:[#allocation14 + $0x30] sm:$0xff] (%p422_p13)  ;;  %v440_v14 = vld [vmem:[#allocation14 + $0x40] sm:$0xff] (%p422_p13)  ;;  %v441_v15 = vld [vmem:[#allocation14 + $0x48] sm:$0xff] (%p422_p13) }
  0xee   : > { %1354 = vmatpush3.bf16.msra.mxu0 (%p422_p13), %v1351_v3  ;;  %1423 = vmatpush3.bf16.msra.mxu1 (%p422_p13), %v1351_v3  ;;  %v1363_v13 = vpack.c.bf16 (%p422_p13), %v439_v12, %v438_v11  ;;  %v1367_v16 = vpack.c.bf16 (%p422_p13), %v441_v15, %v440_v14  ;;  %v442_v17 = vld [vmem:[#allocation14 + $0x50] sm:$0xff] (%p422_p13)  ;;  %v443_v18 = vld [vmem:[#allocation14 + $0x58] sm:$0xff] (%p422_p13)  ;;  %v444_v20 = vld [vmem:[#allocation14 + $0x60] sm:$0xff] (%p422_p13) }
  0xef   : > { %1356 = vmatprep.subr.bf16.mxu0 (%p422_p13), %v1355_v5  ;;  %1416 = vmatprep.subr.bf16.mxu1 (%p422_p13), %v1355_v5  ;;  %v1371_v19 = vpack.c.bf16 (%p422_p13), %v443_v18, %v442_v17  ;;  %v445_v21 = vld [vmem:[#allocation14 + $0x68] sm:$0xff] (%p422_p13)  ;;  %v446_v23 = vld [vmem:[#allocation14 + $0x70] sm:$0xff] (%p422_p13)  ;;  %v447_v24 = vld [vmem:[#allocation14 + $0x78] sm:$0xff] (%p422_p13) }
  0xf0   : > { %1287 = vmatprep.mubr.f32.mxu0 (%p422_p13), %v428_v9  ;;  %1290 = vmatprep.mubr.f32.mxu1 (%p422_p13), %v430_v10  ;;  %v1375_v22 = vpack.c.bf16 (%p422_p13), %v445_v21, %v444_v20  ;;  %v1379_v25 = vpack.c.bf16 (%p422_p13), %v447_v24, %v446_v23  ;;  %v429_v26 = vld [vmem:[#allocation11 + $0x8] sm:$0xff] (%p422_p13)  ;;  %v431_v27 = vld [vmem:[#allocation11 + $0x18] sm:$0xff] (%p422_p13)  ;;  %v1178_v28 = vld [vmem:[%s2408_s23] ss:$0 sm:$0xff] (%p422_p13) }
  0xf2   : > { %1358 = vmatpush3.bf16.msra.mxu0 %v1355_v5  ;;  %1424 = vmatpush3.bf16.msra.mxu1 %v1355_v5 }
  0xf3   : > { %1360 = vmatprep.subr.bf16.mxu0 %v1359_v8  ;;  %1417 = vmatprep.subr.bf16.mxu1 %v1359_v8 }
  0xf6   : > { %1362 = vmatpush3.bf16.msra.mxu0 %v1359_v8  ;;  %1425 = vmatpush3.bf16.msra.mxu1 %v1359_v8 }
  0xf7   : > { %1364 = vmatprep.subr.bf16.mxu0 %v1363_v13  ;;  %1418 = vmatprep.subr.bf16.mxu1 %v1363_v13 }
  0xfa   : > { %1366 = vmatpush3.bf16.msra.mxu0 %v1363_v13  ;;  %1426 = vmatpush3.bf16.msra.mxu1 %v1363_v13 }
  0xfb   : > { %1368 = vmatprep.subr.bf16.mxu0 %v1367_v16  ;;  %1419 = vmatprep.subr.bf16.mxu1 %v1367_v16 }
  0xfe   : > { %1370 = vmatpush3.bf16.msra.mxu0 %v1367_v16  ;;  %1427 = vmatpush3.bf16.msra.mxu1 %v1367_v16 }
  0xff   : > { %1372 = vmatprep.subr.bf16.mxu0 %v1371_v19  ;;  %1420 = vmatprep.subr.bf16.mxu1 %v1371_v19 }
 0x102   : > { %1374 = vmatpush3.bf16.msra.mxu0 %v1371_v19  ;;  %1428 = vmatpush3.bf16.msra.mxu1 %v1371_v19 }
 0x103   : > { %1376 = vmatprep.subr.bf16.mxu0 %v1375_v22  ;;  %1421 = vmatprep.subr.bf16.mxu1 %v1375_v22 }
 0x106   : > { %1378 = vmatpush3.bf16.msra.mxu0 %v1375_v22  ;;  %1429 = vmatpush3.bf16.msra.mxu1 %v1375_v22 }
 0x107   : > { %1380 = vmatprep.subr.bf16.mxu0 %v1379_v25  ;;  %1422 = vmatprep.subr.bf16.mxu1 %v1379_v25 }
 0x10a   : > { %1382 = vmatpush3.bf16.msra.mxu0 %v1379_v25  ;;  %1430 = vmatpush3.bf16.msra.mxu1 %v1379_v25 }
 0x10d   : > { %1288 = vmatmul.mubr.f32.vlgmr.msra.gmra.mrb[0].mxu0 %v429_v26  ;;  %1291 = vmatmul.mubr.f32.vlgmr.msra.gmra.mrb[0].mxu1 %v431_v27 }
 0x1e0   : > { %v1289_v29 = vpop.f32.mrb[0].mxu0  ;;  %v1292_v30 = vpop.f32.mrb[0].mxu1 }
 0x1e1   : > { %v527_v31 = vadd.f32 %v1289_v29, %v1178_v28  ;;  %v537_v32 = vadd.f32 %v1292_v30, %v1178_v28  ;;  %v521_v33 = vpop.f32.mrb[1].mxu0  ;;  %v531_v34 = vpop.f32.mrb[1].mxu1 }
 0x1e2   : > { %v522_v35 = vadd.f32 %v1178_v28, %v521_v33  ;;  %v532_v36 = vadd.f32 %v1178_v28, %v531_v34 }
 0x1e3   : > { %541 = vst [vmem:[#allocation15 + $0x8] sm:$0xff] %v527_v31  ;;  %543 = vst [vmem:[#allocation15 + $0x18] sm:$0xff] %v537_v32 }
 0x1e4   : > { %540 = vst [vmem:[#allocation15] sm:$0xff] %v522_v35  ;;  %542 = vst [vmem:[#allocation15 + $0x10] sm:$0xff] %v532_v36 }
 0x1e5 PF: > { %v1585_v37 = vld [vmem:[%s2264_s28] sm:$0xff]   ;;  %v1586_v38 = vld [vmem:[%s2264_s28 + $0x8] sm:$0xff]   ;;  %v1587_v39 = vld [vmem:[%s2264_s28 + $0x10] sm:$0xff]   ;;  %s1196_s4 = sadd.s32 4294967295, %s2280_s7  ;;  %vm683_vm0 = vcmask 7168  }
 0x1e6   : > { %1293 = vmatprep.subr.bf16.mxu0 %v1585_v37  ;;  %v1588_v40 = vld [vmem:[%s2264_s28 + $0x18] sm:$0xff]   ;;  %v1589_v49 = vld [vmem:[%s2264_s28 + $0x20] sm:$0xff]   ;;  %v1590_v52 = vld [vmem:[%s2264_s28 + $0x28] sm:$0xff]   ;;  %p1198_p4 = scmp.ne.s32.totalorder %s1196_s4, 0 }
 0x1e7   : > { %1294 = vmatpush3.bf16.msra.mxu0 %v1585_v37  ;;  %v547_v41 = vld [vmem:[%s359_s27] sm:$0xff]  ;;  %s2409_s5 = sld [smem:[#allocation26_spill]] (!%p1198_p4)  ;;  %v1887_v3 = vmov (!%p1198_p4), 0  }
 0x1e8   : > { %1295 = vmatprep.subr.bf16.mxu0 %v1586_v38  ;;  %v556_v42 = vunpack.c.l.s8.bf16 %v547_v41  ;;  %v550_v43 = vunpack.c.2.s8 %v547_v41  ;;  %v548_v44 = vunpack.c.0.s8 %v547_v41  ;;  %v551_v45 = vunpack.c.3.s8 %v547_v41  ;;  %v1591_v53 = vld [vmem:[%s2264_s28 + $0x30] sm:$0xff]   ;;  %v1592_v54 = vld [vmem:[%s2264_s28 + $0x38] sm:$0xff]   ;;  %1594 = vset.pattern.permute.xlu1 (!%p1198_p4), %v1887_v3 }
 0x1e9   : > { %v549_v46 = vunpack.c.1.s8 %v547_v41  ;;  %v557_v55 = vunpack.c.h.s8.bf16 %v547_v41  ;;  %1593 = vset.pattern.permute.xlu0 (!%p1198_p4), %v1887_v3 }
 0x1ea   : > { %1309 = vmatprep.mubr.bf16.mxu0 %v556_v42  ;;  %v554_v47 = vcvt.s32.f32 %v550_v43  ;;  %v552_v48 = vcvt.s32.f32 %v548_v44  ;;  %v555_v50 = vcvt.s32.f32 %v551_v45 }
 0x1eb   : > { %1296 = vmatpush3.bf16.msra.mxu0 %v1586_v38  ;;  %v553_v51 = vcvt.s32.f32 %v549_v46 }
 0x1ec   : > { %1297 = vmatprep.subr.bf16.mxu0 %v1587_v39  ;;  %675 = vadd.xlane.f32.xlu1 %v554_v47 }
 0x1ed   : > { %671 = vadd.xlane.f32.xlu0 %v552_v48  ;;  %s1199_s10 = sshll.u32 (!%p1198_p4), %s2409_s5, 7 }
 0x1ee   : > { %s2297_s24 = scalar_lea.vmem (!%p1198_p4), [#allocation12], %s1199_s10 }
 0x1ef   : > { %1298 = vmatpush3.bf16.msra.mxu0 %v1587_v39  ;;  %v898_v9 = vld [vmem:[%s2297_s24] sm:$0xff] (!%p1198_p4)  ;;  %v899_v10 = vld [vmem:[%s2297_s24 + $0x8] sm:$0xff] (!%p1198_p4)  ;;  %v900_v11 = vld [vmem:[%s2297_s24 + $0x10] sm:$0xff] (!%p1198_p4) }
 0x1f0   : > { %1299 = vmatprep.subr.bf16.mxu0 %v1588_v40  ;;  %677 = vadd.xlane.f32.xlu1 %v555_v50  ;;  %v1383_v12 = vpack.c.bf16 (!%p1198_p4), %v899_v10, %v898_v9  ;;  %v901_v13 = vld [vmem:[%s2297_s24 + $0x18] sm:$0xff] (!%p1198_p4)  ;;  %v902_v15 = vld [vmem:[%s2297_s24 + $0x20] sm:$0xff] (!%p1198_p4)  ;;  %v903_v16 = vld [vmem:[%s2297_s24 + $0x28] sm:$0xff] (!%p1198_p4) }
 0x1f1   : > { %673 = vadd.xlane.f32.xlu0 %v553_v51  ;;  %v1387_v14 = vpack.c.bf16 (!%p1198_p4), %v901_v13, %v900_v11  ;;  %v1391_v17 = vpack.c.bf16 (!%p1198_p4), %v903_v16, %v902_v15  ;;  %v904_v18 = vld [vmem:[%s2297_s24 + $0x30] sm:$0xff] (!%p1198_p4)  ;;  %v905_v19 = vld [vmem:[%s2297_s24 + $0x38] sm:$0xff] (!%p1198_p4)  ;;  %v906_v21 = vld [vmem:[%s2297_s24 + $0x40] sm:$0xff] (!%p1198_p4) }
 0x1f2   : > { %1431 = vmatprep.subr.bf16.mxu1 (!%p1198_p4), %v1383_v12  ;;  %v1395_v20 = vpack.c.bf16 (!%p1198_p4), %v905_v19, %v904_v18  ;;  %v907_v22 = vld [vmem:[%s2297_s24 + $0x48] sm:$0xff] (!%p1198_p4)  ;;  %v908_v28 = vld [vmem:[%s2297_s24 + $0x50] sm:$0xff] (!%p1198_p4)  ;;  %v909_v29 = vld [vmem:[%s2297_s24 + $0x58] sm:$0xff] (!%p1198_p4) }
 0x1f3   : > { %1300 = vmatpush3.bf16.msra.mxu0 %v1588_v40  ;;  %1439 = vmatpush3.bf16.msra.mxu1 (!%p1198_p4), %v1383_v12  ;;  %v1399_v26 = vpack.c.bf16 (!%p1198_p4), %v907_v22, %v906_v21  ;;  %v1403_v30 = vpack.c.bf16 (!%p1198_p4), %v909_v29, %v908_v28  ;;  %v910_v31 = vld [vmem:[%s2297_s24 + $0x60] sm:$0xff] (!%p1198_p4)  ;;  %v911_v32 = vld [vmem:[%s2297_s24 + $0x68] sm:$0xff] (!%p1198_p4)  ;;  %v912_v34 = vld [vmem:[%s2297_s24 + $0x70] sm:$0xff] (!%p1198_p4) }
 0x1f4   : > { %1301 = vmatprep.subr.bf16.mxu0 %v1589_v49  ;;  %1432 = vmatprep.subr.bf16.mxu1 (!%p1198_p4), %v1387_v14  ;;  %v1407_v33 = vpack.c.bf16 (!%p1198_p4), %v911_v32, %v910_v31  ;;  %v913_v35 = vld [vmem:[%s2297_s24 + $0x78] sm:$0xff] (!%p1198_p4)  ;;  %v914_v50 = vld [vmem:[#allocation15] sm:$0xff] (!%p1198_p4) }
 0x1f5   : > { %v1411_v36 = vpack.c.bf16 (!%p1198_p4), %v913_v35, %v912_v34 }
 0x1f7   : > { %1302 = vmatpush3.bf16.msra.mxu0 %v1589_v49  ;;  %1440 = vmatpush3.bf16.msra.mxu1 (!%p1198_p4), %v1387_v14  ;;  %v915_v49 = vld [vmem:[#allocation15 + $0x8] sm:$0xff] (!%p1198_p4) }
 0x1f8   : > { %1303 = vmatprep.subr.bf16.mxu0 %v1590_v52  ;;  %1433 = vmatprep.subr.bf16.mxu1 (!%p1198_p4), %v1391_v17 }
 0x1fb   : > { %1304 = vmatpush3.bf16.msra.mxu0 %v1590_v52  ;;  %1441 = vmatpush3.bf16.msra.mxu1 (!%p1198_p4), %v1391_v17 }
 0x1fc   : > { %1305 = vmatprep.subr.bf16.mxu0 %v1591_v53  ;;  %1434 = vmatprep.subr.bf16.mxu1 (!%p1198_p4), %v1395_v20 }
 0x1ff   : > { %1306 = vmatpush3.bf16.msra.mxu0 %v1591_v53  ;;  %1442 = vmatpush3.bf16.msra.mxu1 (!%p1198_p4), %v1395_v20 }
 0x200   : > { %1307 = vmatprep.subr.bf16.mxu0 %v1592_v54  ;;  %1435 = vmatprep.subr.bf16.mxu1 (!%p1198_p4), %v1399_v26 }
 0x203   : > { %1308 = vmatpush3.bf16.msra.mxu0 %v1592_v54  ;;  %1443 = vmatpush3.bf16.msra.mxu1 (!%p1198_p4), %v1399_v26 }
 0x204   : > { %1384 = vmatprep.subr.bf16.mxu0 (!%p1198_p4), %v1383_v12  ;;  %1436 = vmatprep.subr.bf16.mxu1 (!%p1198_p4), %v1403_v30 }
 0x206   : > { %1310 = vmatmul.mubr.bf16.vlgmr.msra.gmra.mrb[0].mxu0 %v557_v55  ;;  %v917_v55 = vld [vmem:[#allocation15 + $0x18] sm:$0xff] (!%p1198_p4) }
 0x207   : > { %1386 = vmatpush3.bf16.msra.mxu0 (!%p1198_p4), %v1383_v12  ;;  %1444 = vmatpush3.bf16.msra.mxu1 (!%p1198_p4), %v1403_v30 }
 0x208   : > { %1388 = vmatprep.subr.bf16.mxu0 (!%p1198_p4), %v1387_v14  ;;  %1437 = vmatprep.subr.bf16.mxu1 (!%p1198_p4), %v1407_v33 }
 0x20b   : > { %1390 = vmatpush3.bf16.msra.mxu0 (!%p1198_p4), %v1387_v14  ;;  %1445 = vmatpush3.bf16.msra.mxu1 (!%p1198_p4), %v1407_v33 }
 0x20c   : > { %1392 = vmatprep.subr.bf16.mxu0 (!%p1198_p4), %v1391_v17  ;;  %1438 = vmatprep.subr.bf16.mxu1 (!%p1198_p4), %v1411_v36 }
 0x20f   : > { %1394 = vmatpush3.bf16.msra.mxu0 (!%p1198_p4), %v1391_v17  ;;  %1446 = vmatpush3.bf16.msra.mxu1 (!%p1198_p4), %v1411_v36 }
 0x210   : > { %1396 = vmatprep.subr.bf16.mxu0 (!%p1198_p4), %v1395_v20 }
 0x213   : > { %1398 = vmatpush3.bf16.msra.mxu0 (!%p1198_p4), %v1395_v20 }
 0x214   : > { %1400 = vmatprep.subr.bf16.mxu0 (!%p1198_p4), %v1399_v26 }
 0x217   : > { %1402 = vmatpush3.bf16.msra.mxu0 (!%p1198_p4), %v1399_v26 }
 0x218   : > { %1404 = vmatprep.subr.bf16.mxu0 (!%p1198_p4), %v1403_v30 }
 0x21b   : > { %1406 = vmatpush3.bf16.msra.mxu0 (!%p1198_p4), %v1403_v30 }
 0x21c   : > { %1408 = vmatprep.subr.bf16.mxu0 (!%p1198_p4), %v1407_v33 }
 0x21f   : > { %1410 = vmatpush3.bf16.msra.mxu0 (!%p1198_p4), %v1407_v33 }
 0x220   : > { %1412 = vmatprep.subr.bf16.mxu0 (!%p1198_p4), %v1411_v36 }
 0x223   : > { %1414 = vmatpush3.bf16.msra.mxu0 (!%p1198_p4), %v1411_v36 }
 0x279   : > { %v676_v56 = vpop.xlane.xlu1 %675 }
 0x27a   : > { %v672_v57 = vpop.xlane.xlu0 %671  ;;  %686 = vst.msk [vmem:[#allocation3 + $0x10] sm:$0xff] %vm683_vm0, %v676_v56  ;;  %v916_v56 = vld [vmem:[#allocation15 + $0x10] sm:$0xff] (!%p1198_p4) }
 0x27b   : > { %684 = vst.msk [vmem:[#allocation3] sm:$0xff] %vm683_vm0, %v672_v57 }
 0x27d   : > { %v678_v58 = vpop.xlane.xlu1 %677 }
 0x27e   : > { %v674_v59 = vpop.xlane.xlu0 %673  ;;  %687 = vst.msk [vmem:[#allocation3 + $0x18] sm:$0xff] %vm683_vm0, %v678_v58 }
 0x27f   : > { %685 = vst.msk [vmem:[#allocation3 + $0x8] sm:$0xff] %vm683_vm0, %v674_v59 }
 0x281   : > { %v858_v7 = vld [vmem:[#allocation3 + $0x10] sm:$0xff] (!%p1198_p4) }
 0x282   : > { %v856_v1 = vld [vmem:[#allocation3] sm:$0xff] (!%p1198_p4)  ;;  %v862_v8 = vmax.f32 (!%p1198_p4), %v858_v7, 1.0 }
 0x283   : > { %v860_v5 = vmax.f32 (!%p1198_p4), %v856_v1, 1.0 }
 0x285   : > { %v859_v2 = vld [vmem:[#allocation3 + $0x18] sm:$0xff] (!%p1198_p4) }
 0x286   : > { %v857_v0 = vld [vmem:[#allocation3 + $0x8] sm:$0xff] (!%p1198_p4)  ;;  %v863_v6 = vmax.f32 (!%p1198_p4), %v859_v2, 1.0 }
 0x287   : > { %v861_v4 = vmax.f32 (!%p1198_p4), %v857_v0, 1.0 }
 0x289   : > { %1595 = vrcp.f32 (!%p1198_p4), %v861_v4 }
 0x28a   : > { %1597 = vrcp.f32 (!%p1198_p4), %v860_v5 }
 0x28b   : > { %1599 = vrcp.f32 (!%p1198_p4), %v863_v6 }
 0x28c   : > { %1601 = vrcp.f32 (!%p1198_p4), %v862_v8 }
 0x293   : > { %v1596_v23 = vpop.eup (!%p1198_p4), %1595 }
 0x294   : > { %v1598_v24 = vpop.eup (!%p1198_p4), %1597  ;;  %879 = vperm.xlu1 (!%p1198_p4), %1594, %v1596_v23  }
 0x295   : > { %v1600_v25 = vpop.eup (!%p1198_p4), %1599  ;;  %874 = vperm.xlu0 (!%p1198_p4), %1593, %v1598_v24  }
 0x296   : > { %v1602_v27 = vpop.eup (!%p1198_p4), %1601 }
 0x298   : > { %889 = vperm.xlu1 (!%p1198_p4), %1594, %v1600_v25  }
 0x299   : > { %884 = vperm.xlu0 (!%p1198_p4), %1593, %v1602_v27  }
 0x2d7   : > { %855 = sbr.rel (%p1198_p4) target bundleno = 1012 (0x3f4), region = 80 }
 0x2d9   : > { %v1311_v60 = vpop.f32.mrb[0].mxu0 }
 0x2da   : > { %681 = vst [vmem:[#allocation2 + $0x10] sm:$0xff] %v1311_v60  ;;  %v656_v61 = vpop.f32.mrb[1].mxu0 }
 0x2db   : > { %679 = vst [vmem:[#allocation2] sm:$0xff] %v656_v61  ;;  %v1312_v62 = vpop.f32.mrb[2].mxu0 }
 0x2dc   : > { %682 = vst [vmem:[#allocation2 + $0x18] sm:$0xff] %v1312_v62  ;;  %v659_v63 = vpop.f32.mrb[3].mxu0 }
 0x2dd   : > { %680 = vst [vmem:[#allocation2 + $0x8] sm:$0xff] %v659_v63 }
 0x2e1   : > { %v870_v44 = vld [vmem:[#allocation2 + $0x10] sm:$0xff] }
 0x2e2   : > { %v868_v38 = vld [vmem:[#allocation2] sm:$0xff] }
 0x2e3   : > { %v871_v43 = vld [vmem:[#allocation2 + $0x18] sm:$0xff] }
 0x2e4   : > { %v869_v37 = vld [vmem:[#allocation2 + $0x8] sm:$0xff] }
 0x313   : > { %v880_v39 = vpop.permute.xlu1 %879 }
 0x314   : > { %v893_v40 = vmul.f32 %v880_v39, %v869_v37  ;;  %v875_v41 = vpop.permute.xlu0 %874 }
 0x315   : > { %v892_v42 = vmul.f32 %v875_v41, %v868_v38 }
 0x317   : > { %1345 = vmatprep.mubr.f32.mxu0 %v892_v42  ;;  %v890_v45 = vpop.permute.xlu1 %889 }
 0x318   : > { %v895_v46 = vmul.f32 %v890_v45, %v871_v43  ;;  %1346 = vmatmul.mubr.f32.vlgmr.msra.gmra.mrb[0].mxu0 %v893_v40  ;;  %v885_v47 = vpop.permute.xlu0 %884 }
 0x319   : > { %v894_v48 = vmul.f32 %v885_v47, %v870_v44 }
 0x31b   : > { %1348 = vmatprep.mubr.f32.mxu1 %v894_v48 }
 0x31c   : > { %1349 = vmatmul.mubr.f32.vlgmr.msra.gmra.mrb[0].mxu1 %v895_v46 }
 0x3eb   : > { %v1347_v51 = vpop.f32.mrb[0].mxu0 }
 0x3ec   : > { %v1004_v52 = vadd.f32 %v1347_v51, %v915_v49  ;;  %v984_v53 = vpop.f32.mrb[1].mxu0 }
 0x3ed   : > { %v1003_v54 = vadd.f32 %v984_v53, %v914_v50 }
 0x3ee   : > { %1008 = vst [vmem:[#allocation15 + $0x8] sm:$0xff] %v1004_v52 }
 0x3ef   : > { %1007 = vst [vmem:[#allocation15] sm:$0xff] %v1003_v54  ;;  %v1350_v57 = vpop.f32.mrb[0].mxu1 }
 0x3f0   : > { %v1006_v58 = vadd.f32 %v1350_v57, %v917_v55  ;;  %v994_v59 = vpop.f32.mrb[1].mxu1 }
 0x3f1   : > { %v1005_v60 = vadd.f32 %v994_v59, %v916_v56 }
 0x3f2   : > { %1010 = vst [vmem:[#allocation15 + $0x18] sm:$0xff] %v1006_v58 }
 0x3f3   : > { %1009 = vst [vmem:[#allocation15 + $0x10] sm:$0xff] %v1005_v60 }
 0x3f4 PF: > { %p1499_p5 = scmp.eq.s32.totalorder %s1987_s19, 1  ;;  %s1888_s3 = smov [#allocation15]  }
 0x3f5   : > { %s1020_s29 = sshll.u32 %s1888_s3, 4  ;;  %s1021_s29 = int_to_ptr.vmem [resolvable:$true] %s1020_s29 }
 0x3f6   : > { %s1757_s30 = scalar_lea.vmem %s1021_s29, 512  ;;  %p1764_p12 = scmp.lt.s32.totalorder %s1021_s29, %s1021_s29 }
 0x3f7   : > { %p1758_p1 = scmp.ne.s32.totalorder %s1021_s29, %s1757_s30  ;;  %p1765_p7 = scmp.lt.s32.totalorder %s1757_s30, %s1757_s30 }
 0x3f9   : > { %p1759_p9 = pnand %p1758_p1, %p1499_p5  ;;  %p1766_p0 = por %p1765_p7, %p1764_p12 }
 0x3fb   : > { %p1760_p8 = pneg %p1759_p9 }
 0x3fd   : > { %p1767_p10 = pnand %p1766_p0, %p1760_p8 }
 0x3ff   : > { %1770 = shalt.err (!%p1767_p10)
}
 0x400   : > { %s2410_s27 = sld [smem:[#allocation32_spill]] }
 0x406   : > { %s1771_s14 = scalar_lea.hbm %s2410_s27, 512 }
 0x407   : > { %p1772_p2 = scmp.ne.s32.totalorder %s2410_s27, %s1771_s14  ;;  %p1777_p11 = scmp.lt.u32.totalorder %s1771_s14, %s2410_s27 }
 0x409   : > { %p1773_p3 = pnand %p1772_p2, %p1499_p5 }
 0x40b   : > { %p1774_p6 = pneg %p1773_p3 }
 0x40d   : > { %p1779_p13 = pnand %p1777_p11, %p1774_p6 }
 0x40f   : > { %1782 = shalt.err (!%p1779_p13)
}
 0x410   : > { %s1889_s16 = smov 128   ;;  %s1890_s7 = smov 8  }
 0x411   : > { %1468 = dma.vmem_to_hbm [thread:$0]  (%p1499_p5), %s1021_s29, 512, %s2410_s27, [#allocation8], %s1889_s16, %s1889_s16, %s1890_s7  }
 0x412   : > { %1838 = dma.done.wait (%p1499_p5), [#allocation8], 512  }
 0x413   : > { %1840 = vsyncadd (%p1499_p5), [#allocation8], 4294966784 }
 0x414 PF: > { %s29_s18 = sadd.s32 1, %s1875_s18   ;;  %s2411_s23 = sld [smem:[#allocation27_spill]] }
 0x415   : > { %p26_p4 = scmp.ge.s32.totalorder %s29_s18, 4   ;;  %s2412_s11 = smov %s1847_s12 }
 0x416   : > { %s2413_s12 = smov %s1851_s13  ;;  %s2414_s13 = smov %s2149_s9 }
 0x417   : > { %s2415_s14 = smov %s1859_s15  ;;  %s2416_s15 = smov %s1863_s0 }
 0x418   : > { %s2417_s0 = smov %s2128_s26  ;;  %s2418_s16 = smov %s1871_s17 }
 0x419   :  { %28 = sbr.rel (!%p26_p4) target bundleno = 23 (0x17), region = 125 }
 0x41a   : > { %s2419_s17 = smov %s2411_s23 }
 0x420   :  { %1036 = vsyncpa [#allocation7], 1 }
 0x421   :  { %1038 = vsyncpa [#allocation7 + $0x1], 1 }
 0x422   :  { %1039 = vsyncpa [#allocation10], 1 }
 0x423   :  { %1041 = vsyncpa [#allocation10 + $0x1], 1 }
 0x424   :  { %1042 = vsyncpa [#allocation13], 1 }
 0x425   :  { %1043 = vsyncpa [#allocation8], 1 }
 0x426   :  { %1045 = vsyncpa [#allocation8 + $0x1], 1 }

</bundles_post_ra>
